<compile_context>
chip_gen: v5e
topology: v5e:2x2
jax: 0.10.0
libtpu: 0.0.40
codegen_flags: <defaults>
</compile_context>

<pallas_src>
import functools

import jax
import jax.numpy as jnp
from jax.experimental import pallas as pl
from jax.experimental.pallas import tpu as pltpu


def _round_up(x, m):
    return ((x + m - 1) // m) * m


def columnfc_kernel(x_ref,
                    w1_ref, b1_ref,
                    w2_ref, b2_ref,
                    w3_ref, b3_ref,
                    w4_ref, b4_ref,
                    o_ref,
                    *, bf16_epilogue: bool):
    """Fused forward: (Linear+ReLU) x3 -> Linear on the current batch tile.

    MXU inputs are bf16 with f32 accumulation; bias-add / ReLU run in bf16
    (v6e/v7x) or f32 (v5e).  The f32 -> bf16 cast of x happens here, in VMEM.
    """
    act_dt = jnp.bfloat16 if bf16_epilogue else jnp.float32

    # In-kernel cast of the f32 input tile (no wrapper-side pad/cast pass).
    xb = x_ref[...].astype(jnp.bfloat16)

    def layer(h_bf16, w_ref, b_ref):
        acc = jnp.dot(h_bf16, w_ref[...], preferred_element_type=jnp.float32)
        acc = acc.astype(act_dt) + b_ref[...].astype(act_dt)
        # TODO(synk): dropout is identity here (inference mode); training-mode
        # dropout would use pltpu.prng_seed + pltpu.stateful_bernoulli.
        return jnp.maximum(acc, 0).astype(jnp.bfloat16)

    h = layer(xb, w1_ref, b1_ref)        # (bb, 512)
    h = layer(h, w2_ref, b2_ref)         # (bb, 256)
    h = layer(h, w3_ref, b3_ref)         # (bb, 128)

    out = jnp.dot(h, w4_ref[...], preferred_element_type=jnp.float32) + b4_ref[...]
    o_ref[...] = out.astype(o_ref.dtype)  # (bb, 128) f32, lane-dense store


@functools.partial(jax.jit,
                   static_argnames=("output_dim", "block_b",
                                    "bf16_epilogue", "pad_output"))
def columnfc_forward(x, params, output_dim=100, block_b=1024,
                     bf16_epilogue=None, pad_output=False):
    """x: (B, input_dim) float32 (passed to the kernel as-is, no copies).
    params: prepared kernel params — w{i} transposed to (in, out), bf16;
    b1..b3 bf16 (1, out); b4 f32 (1, out_pad); w4/b4 lane-padded to 128."""
    B, in_dim = x.shape
    w1, b1 = params["w1"], params["b1"]
    w2, b2 = params["w2"], params["b2"]
    w3, b3 = params["w3"], params["b3"]
    w4, b4 = params["w4"], params["b4"]
    out_pad = w4.shape[1]

    if bf16_epilogue is None:
        # v5e has no bf16 VALU; keep its epilogue in f32.  Pure trace-time check.
        kind = jax.devices()[0].device_kind.lower()
        bf16_epilogue = not ("v5e" in kind or "v5 lite" in kind or "v5lite" in kind)

    # Batch tile selection:
    #  * big tiles amortize the ~0.35us per-grid-step pipeline overhead;
    #  * for mid/large batches make sure grid >= 2 so the ("parallel",) axis
    #    can shard across v7x's two TensorCores;
    #  * tiny batches use one exact tile (block == full batch dim is legal).
    if B <= block_b:
        if B >= 512:
            bb = _round_up((B + 1) // 2, 16)   # split into 2 grid steps
        else:
            bb = B                              # single exact tile
    else:
        bb = block_b
    grid_n = -(-B // bb)                        # ragged last block is fine

    # Weights/biases: constant index_map -> VMEM-resident across the grid.
    def full(arr):
        n = arr.ndim
        return pl.BlockSpec(arr.shape, lambda i, _n=n: (0,) * _n)

    mac = in_dim * 512 + 512 * 256 + 256 * 128 + 128 * out_pad
    cost = pl.CostEstimate(
        flops=2 * B * mac,
        transcendentals=0,
        bytes_accessed=(B * in_dim * 4 + B * out_pad * 4
                        + 2 * mac + 2 * (512 + 256 + 128) + 4 * out_pad),
    )

    kernel = functools.partial(columnfc_kernel, bf16_epilogue=bf16_epilogue)

    out_padded = pl.pallas_call(
        kernel,
        out_shape=jax.ShapeDtypeStruct((B, out_pad), jnp.float32),
        grid_spec=pltpu.PrefetchScalarGridSpec(
            num_scalar_prefetch=0,
            grid=(grid_n,),
            in_specs=[
                pl.BlockSpec((bb, in_dim), lambda i: (i, 0)),   # x tile (f32)
                full(w1), full(b1),
                full(w2), full(b2),
                full(w3), full(b3),
                full(w4), full(b4),
            ],
            out_specs=pl.BlockSpec((bb, out_pad), lambda i: (i, 0)),
        ),
        compiler_params=pltpu.CompilerParams(
            dimension_semantics=("parallel",),
            vmem_limit_bytes=32 * 1024 * 1024,  # v5e default (16 MiB) is too small
        ),
        cost_estimate=cost,
    )(x, w1, b1, w2, b2, w3, b3, w4, b4)

    if pad_output:
        # Skip the column-slice copy; consumer can fuse/ignore the zero columns.
        return out_padded
    return out_padded[:, :output_dim]


def init_params(key, input_dim=100, output_dim=100):
    """Deterministic synthetic parameters with nn.Linear layout:
    weight (out, in), bias (out,), f32 — matching the PyTorch module."""
    dims = [(input_dim, 512), (512, 256), (256, 128), (128, output_dim)]
    params = {}
    for li, (fan_in, fan_out) in enumerate(dims, start=1):
        key, kw, kb = jax.random.split(key, 3)
        bound = 1.0 / jnp.sqrt(jnp.float32(fan_in))
        params[f"w{li}"] = jax.random.uniform(
            kw, (fan_out, fan_in), jnp.float32, -bound, bound)
        params[f"b{li}"] = jax.random.uniform(
            kb, (fan_out,), jnp.float32, -bound, bound)
    return params


def prepare_params(raw, input_dim=100, output_dim=100):
    """Transpose to (in, out) and cast weights to bf16 (MXU inputs).
    Only the OUTPUT side (w4 cols / b4) is zero-padded to 128 so stores stay
    lane-dense; the input contraction (K=100) is handled by the MXU directly.
    b1..b3 are bf16 (epilogue dtype is chosen in-kernel); b4 stays f32."""
    out_pad = _round_up(output_dim, 128)
    p = {}
    p["w1"] = raw["w1"].T.astype(jnp.bfloat16)                       # (100, 512)
    p["b1"] = raw["b1"].reshape(1, -1).astype(jnp.bfloat16)
    p["w2"] = raw["w2"].T.astype(jnp.bfloat16)                       # (512, 256)
    p["b2"] = raw["b2"].reshape(1, -1).astype(jnp.bfloat16)
    p["w3"] = raw["w3"].T.astype(jnp.bfloat16)                       # (256, 128)
    p["b3"] = raw["b3"].reshape(1, -1).astype(jnp.bfloat16)
    w4 = jnp.pad(raw["w4"].T, ((0, 0), (0, out_pad - output_dim)))
    p["w4"] = w4.astype(jnp.bfloat16)                                # (128, 128)
    p["b4"] = jnp.pad(raw["b4"], (0, out_pad - output_dim)).reshape(1, -1).astype(jnp.float32)
    return p


def columnfc_reference(x, raw):
    """Pure-JAX f32 reference of the same forward (dropout = identity)."""
    h = jnp.maximum(x @ raw["w1"].T + raw["b1"], 0.0)
    h = jnp.maximum(h @ raw["w2"].T + raw["b2"], 0.0)
    h = jnp.maximum(h @ raw["w3"].T + raw["b3"], 0.0)
    return h @ raw["w4"].T + raw["b4"]


if __name__ == "__main__":
    key = jax.random.PRNGKey(0)
    kx1, kx2, kp = jax.random.split(key, 3)

    INPUT_DIM, OUTPUT_DIM = 100, 100
    raw = init_params(kp, INPUT_DIM, OUTPUT_DIM)
    prepared = prepare_params(raw, INPUT_DIM, OUTPUT_DIM)

    # Small batch: single exact tile (bb == B == 8), default block_b.
    x1 = jax.random.normal(kx1, (8, INPUT_DIM), dtype=jnp.float32)
    out1 = jax.block_until_ready(
        columnfc_forward(x1, prepared, output_dim=OUTPUT_DIM))
    ref1 = columnfc_reference(x1, raw)
    assert out1.shape == (8, OUTPUT_DIM), out1.shape
    assert jnp.allclose(out1, ref1, atol=3e-2, rtol=3e-2), \
        "mismatch vs reference (B=8)"

    # Multi-tile: grid of 2 with a ragged last block (200 = 128 + 72).
    x2 = jax.random.normal(kx2, (200, INPUT_DIM), dtype=jnp.float32)
    out2 = jax.block_until_ready(
        columnfc_forward(x2, prepared, output_dim=OUTPUT_DIM, block_b=128))
    ref2 = columnfc_reference(x2, raw)
    assert out2.shape == (200, OUTPUT_DIM), out2.shape
    assert jnp.allclose(out2, ref2, atol=3e-2, rtol=3e-2), \
        "mismatch vs reference (B=200)"

    print("KERNEL_OK")
</pallas_src>

<mosaic_0001>
module attributes {stable_mosaic.version = 11 : i64} {
  func.func @columnfc_kernel(%arg0: i32, %arg1: memref<8x100xf32, #tpu.memory_space<vmem>>, %arg2: memref<100x512xbf16, #tpu.memory_space<vmem>>, %arg3: memref<1x512xbf16, #tpu.memory_space<vmem>>, %arg4: memref<512x256xbf16, #tpu.memory_space<vmem>>, %arg5: memref<1x256xbf16, #tpu.memory_space<vmem>>, %arg6: memref<256x128xbf16, #tpu.memory_space<vmem>>, %arg7: memref<1x128xbf16, #tpu.memory_space<vmem>>, %arg8: memref<128x128xbf16, #tpu.memory_space<vmem>>, %arg9: memref<1x128xf32, #tpu.memory_space<vmem>>, %arg10: memref<8x128xf32, #tpu.memory_space<vmem>>) attributes {dimension_semantics = [#tpu.dimension_semantics<parallel>], iteration_bounds = array<i64: 1>, scalar_prefetch = 0 : i64, scratch_operands = 0 : i64, tpu.core_type = #tpu.core_type<tc>, window_params = [{transform_indices = @transform_0, window_bounds = array<i64: 8, 100>}, {pipeline_mode = #tpu.pipeline_mode<synchronous>, transform_indices = @transform_1, window_bounds = array<i64: 100, 512>}, {pipeline_mode = #tpu.pipeline_mode<synchronous>, transform_indices = @transform_2, window_bounds = array<i64: 1, 512>}, {pipeline_mode = #tpu.pipeline_mode<synchronous>, transform_indices = @transform_3, window_bounds = array<i64: 512, 256>}, {pipeline_mode = #tpu.pipeline_mode<synchronous>, transform_indices = @transform_4, window_bounds = array<i64: 1, 256>}, {pipeline_mode = #tpu.pipeline_mode<synchronous>, transform_indices = @transform_5, window_bounds = array<i64: 256, 128>}, {pipeline_mode = #tpu.pipeline_mode<synchronous>, transform_indices = @transform_6, window_bounds = array<i64: 1, 128>}, {pipeline_mode = #tpu.pipeline_mode<synchronous>, transform_indices = @transform_7, window_bounds = array<i64: 128, 128>}, {pipeline_mode = #tpu.pipeline_mode<synchronous>, transform_indices = @transform_8, window_bounds = array<i64: 1, 128>}, {transform_indices = @transform_9, window_bounds = array<i64: 8, 128>}]} {
    %c0 = arith.constant 0 : index
    %c0_0 = arith.constant 0 : index
    %0 = vector.load %arg1[%c0, %c0_0] : memref<8x100xf32, #tpu.memory_space<vmem>>, vector<8x100xf32>
    %1 = arith.truncf %0 : vector<8x100xf32> to vector<8x100xbf16>
    %c0_1 = arith.constant 0 : index
    %c0_2 = arith.constant 0 : index
    %2 = vector.load %arg2[%c0_1, %c0_2] : memref<100x512xbf16, #tpu.memory_space<vmem>>, vector<100x512xbf16>
    %cst = arith.constant dense<0.000000e+00> : vector<8x512xf32>
    %3 = tpu.matmul %1, %2, %cst {dimension_numbers = #tpu.dot_dimension_numbers<[1], [0], [0], [1], [0, 0, 1, 1], [], []>} : vector<8x100xbf16>, vector<100x512xbf16>, vector<8x512xf32> -> vector<8x512xf32>
    %4 = arith.truncf %3 : vector<8x512xf32> to vector<8x512xbf16>
    %c0_3 = arith.constant 0 : index
    %c0_4 = arith.constant 0 : index
    %5 = vector.load %arg3[%c0_3, %c0_4] : memref<1x512xbf16, #tpu.memory_space<vmem>>, vector<1x512xbf16>
    %6 = vector.broadcast %5 : vector<1x512xbf16> to vector<8x512xbf16>
    %7 = arith.addf %4, %6 : vector<8x512xbf16>
    %cst_5 = arith.constant 0.000000e+00 : bf16
    %8 = vector.broadcast %cst_5 : bf16 to vector<8x512xbf16>
    %9 = arith.maximumf %7, %8 : vector<8x512xbf16>
    %c0_6 = arith.constant 0 : index
    %c0_7 = arith.constant 0 : index
    %10 = vector.load %arg4[%c0_6, %c0_7] : memref<512x256xbf16, #tpu.memory_space<vmem>>, vector<512x256xbf16>
    %cst_8 = arith.constant dense<0.000000e+00> : vector<8x256xf32>
    %11 = tpu.matmul %9, %10, %cst_8 {dimension_numbers = #tpu.dot_dimension_numbers<[1], [0], [0], [1], [0, 0, 1, 1], [], []>} : vector<8x512xbf16>, vector<512x256xbf16>, vector<8x256xf32> -> vector<8x256xf32>
    %12 = arith.truncf %11 : vector<8x256xf32> to vector<8x256xbf16>
    %c0_9 = arith.constant 0 : index
    %c0_10 = arith.constant 0 : index
    %13 = vector.load %arg5[%c0_9, %c0_10] : memref<1x256xbf16, #tpu.memory_space<vmem>>, vector<1x256xbf16>
    %14 = vector.broadcast %13 : vector<1x256xbf16> to vector<8x256xbf16>
    %15 = arith.addf %12, %14 : vector<8x256xbf16>
    %cst_11 = arith.constant 0.000000e+00 : bf16
    %16 = vector.broadcast %cst_11 : bf16 to vector<8x256xbf16>
    %17 = arith.maximumf %15, %16 : vector<8x256xbf16>
    %c0_12 = arith.constant 0 : index
    %c0_13 = arith.constant 0 : index
    %18 = vector.load %arg6[%c0_12, %c0_13] : memref<256x128xbf16, #tpu.memory_space<vmem>>, vector<256x128xbf16>
    %cst_14 = arith.constant dense<0.000000e+00> : vector<8x128xf32>
    %19 = tpu.matmul %17, %18, %cst_14 {dimension_numbers = #tpu.dot_dimension_numbers<[1], [0], [0], [1], [0, 0, 1, 1], [], []>} : vector<8x256xbf16>, vector<256x128xbf16>, vector<8x128xf32> -> vector<8x128xf32>
    %20 = arith.truncf %19 : vector<8x128xf32> to vector<8x128xbf16>
    %c0_15 = arith.constant 0 : index
    %c0_16 = arith.constant 0 : index
    %21 = vector.load %arg7[%c0_15, %c0_16] : memref<1x128xbf16, #tpu.memory_space<vmem>>, vector<1x128xbf16>
    %22 = vector.broadcast %21 : vector<1x128xbf16> to vector<8x128xbf16>
    %23 = arith.addf %20, %22 : vector<8x128xbf16>
    %cst_17 = arith.constant 0.000000e+00 : bf16
    %24 = vector.broadcast %cst_17 : bf16 to vector<8x128xbf16>
    %25 = arith.maximumf %23, %24 : vector<8x128xbf16>
    %c0_18 = arith.constant 0 : index
    %c0_19 = arith.constant 0 : index
    %26 = vector.load %arg8[%c0_18, %c0_19] : memref<128x128xbf16, #tpu.memory_space<vmem>>, vector<128x128xbf16>
    %cst_20 = arith.constant dense<0.000000e+00> : vector<8x128xf32>
    %27 = tpu.matmul %25, %26, %cst_20 {dimension_numbers = #tpu.dot_dimension_numbers<[1], [0], [0], [1], [0, 0, 1, 1], [], []>} : vector<8x128xbf16>, vector<128x128xbf16>, vector<8x128xf32> -> vector<8x128xf32>
    %c0_21 = arith.constant 0 : index
    %c0_22 = arith.constant 0 : index
    %28 = vector.load %arg9[%c0_21, %c0_22] : memref<1x128xf32, #tpu.memory_space<vmem>>, vector<1x128xf32>
    %29 = vector.broadcast %28 : vector<1x128xf32> to vector<8x128xf32>
    %30 = arith.addf %27, %29 : vector<8x128xf32>
    %c0_23 = arith.constant 0 : index
    %c0_24 = arith.constant 0 : index
    %31 = vector.load %arg10[%c0_23, %c0_24] : memref<8x128xf32, #tpu.memory_space<vmem>>, vector<8x128xf32>
    tpu.vector_store %arg10[%c0_23, %c0_24], %30 {strides = array<i32>} : memref<8x128xf32, #tpu.memory_space<vmem>>, vector<8x128xf32>,
    return
  }
  func.func @transform_0(%arg0: i32) -> (i32, i32) {
    %c0_i32 = arith.constant 0 : i32
    %c0_i32_0 = arith.constant 0 : i32
    return %arg0, %c0_i32 : i32, i32
  }
  func.func @transform_1(%arg0: i32) -> (i32, i32) {
    %c0_i32 = arith.constant 0 : i32
    %c0_i32_0 = arith.constant 0 : i32
    %c0_i32_1 = arith.constant 0 : i32
    return %c0_i32, %c0_i32_0 : i32, i32
  }
  func.func @transform_2(%arg0: i32) -> (i32, i32) {
    %c0_i32 = arith.constant 0 : i32
    %c0_i32_0 = arith.constant 0 : i32
    %c0_i32_1 = arith.constant 0 : i32
    return %c0_i32, %c0_i32_0 : i32, i32
  }
  func.func @transform_3(%arg0: i32) -> (i32, i32) {
    %c0_i32 = arith.constant 0 : i32
    %c0_i32_0 = arith.constant 0 : i32
    %c0_i32_1 = arith.constant 0 : i32
    return %c0_i32, %c0_i32_0 : i32, i32
  }
  func.func @transform_4(%arg0: i32) -> (i32, i32) {
    %c0_i32 = arith.constant 0 : i32
    %c0_i32_0 = arith.constant 0 : i32
    %c0_i32_1 = arith.constant 0 : i32
    return %c0_i32, %c0_i32_0 : i32, i32
  }
  func.func @transform_5(%arg0: i32) -> (i32, i32) {
    %c0_i32 = arith.constant 0 : i32
    %c0_i32_0 = arith.constant 0 : i32
    %c0_i32_1 = arith.constant 0 : i32
    return %c0_i32, %c0_i32_0 : i32, i32
  }
  func.func @transform_6(%arg0: i32) -> (i32, i32) {
    %c0_i32 = arith.constant 0 : i32
    %c0_i32_0 = arith.constant 0 : i32
    %c0_i32_1 = arith.constant 0 : i32
    return %c0_i32, %c0_i32_0 : i32, i32
  }
  func.func @transform_7(%arg0: i32) -> (i32, i32) {
    %c0_i32 = arith.constant 0 : i32
    %c0_i32_0 = arith.constant 0 : i32
    %c0_i32_1 = arith.constant 0 : i32
    return %c0_i32, %c0_i32_0 : i32, i32
  }
  func.func @transform_8(%arg0: i32) -> (i32, i32) {
    %c0_i32 = arith.constant 0 : i32
    %c0_i32_0 = arith.constant 0 : i32
    %c0_i32_1 = arith.constant 0 : i32
    return %c0_i32, %c0_i32_0 : i32, i32
  }
  func.func @transform_9(%arg0: i32) -> (i32, i32) {
    %c0_i32 = arith.constant 0 : i32
    %c0_i32_0 = arith.constant 0 : i32
    return %arg0, %c0_i32 : i32, i32
  }
}

</mosaic_0001>

<bundles_post_ra>
// kernel: columnfc_forward.1
= control target key start
LH: loop header
LB: loop body
LE: loop exit
PB: predicated region body
PF: predicated region fallthrough
CT: control target
= control target key end

     0   :  { %14 = vsyncpa [#allocation3], 0  ;;  %s2082_s0 = inlined_call_operand.hbm [shape: f32[8,100], index: 0, kind: input, shape index: {}]   ;;  %s2083_s1 = inlined_call_operand.hbm [shape: bf16[100,512], index: 1, kind: input, shape index: {}]   ;;  %s2084_s2 = inlined_call_operand.hbm [shape: bf16[1,512], index: 2, kind: input, shape index: {}]   ;;  %s2085_s3 = inlined_call_operand.hbm [shape: bf16[512,256], index: 3, kind: input, shape index: {}]   ;;  %s2086_s4 = inlined_call_operand.hbm [shape: bf16[1,256], index: 4, kind: input, shape index: {}]   ;;  %s2087_s5 = inlined_call_operand.hbm [shape: bf16[256,128], index: 5, kind: input, shape index: {}]   ;;  %s2088_s6 = inlined_call_operand.vmem [shape: bf16[1,128], index: 6, kind: input, shape index: {}]   ;;  %s2089_s7 = inlined_call_operand.hbm [shape: bf16[128,128], index: 7, kind: input, shape index: {}]   ;;  %s2090_s8 = inlined_call_operand.vmem [shape: f32[1,128], index: 8, kind: input, shape index: {}]   ;;  %s2091_s9 = inlined_call_operand.hbm [shape: f32[8,128], index: 9, kind: output, shape index: {}]  }
   0x1   :  { %15 = vsyncpa [#allocation6], 0 }
   0x2   :  { %16 = vsyncpa [#allocation9], 0 }
   0x3   :  { %17 = vsyncpa [#allocation12], 0  ;;  %s34_s11 = sshll.u32 %s2083_s1, 4  ;;  %s35_s11 = int_to_ptr.hbm [resolvable:$true] %s34_s11 }
   0x4   :  { %18 = vsyncpa [#allocation4], 0  ;;  %s1974_s12 = smov [#allocation5]   ;;  %s58_s16 = sshll.u32 %s2085_s3, 4  ;;  %s59_s16 = int_to_ptr.hbm [resolvable:$true] %s58_s16 }
   0x5   :  { %s36_s13 = sshll.u32 %s1974_s12, 4  ;;  %s1975_s17 = smov 256   ;;  %s37_s13 = int_to_ptr.vmem [resolvable:$true] %s36_s13 }
   0x6   :  { %s1976_s18 = smov 16   ;;  %s1977_s19 = smov [#allocation8]  }
   0x7   :  { %42 = dma.hbm_to_vmem [thread:$0]  %s35_s11, 3328, %s37_s13, [#allocation6], %s1975_s17, %s1975_s17, %s1976_s18  }
   0x8   :  { %s60_s20 = sshll.u32 %s1977_s19, 4  ;;  %s1978_s21 = smov 128   ;;  %s61_s20 = int_to_ptr.vmem [resolvable:$true] %s60_s20 }
   0x9   :  { %s1979_s22 = smov 8   ;;  %s82_s24 = sshll.u32 %s2087_s5, 4  ;;  %s83_s24 = int_to_ptr.hbm [resolvable:$true] %s82_s24 }
   0xa   :  { %66 = dma.hbm_to_vmem [thread:$0]  %s59_s16, 8192, %s61_s20, [#allocation9], %s1978_s21, %s1978_s21, %s1979_s22  }
   0xb   :  { %s1980_s25 = smov [#allocation11]   ;;  %s24_s28 = sshll.u32 %s2082_s0, 4  ;;  %s25_s28 = int_to_ptr.hbm [resolvable:$true] %s24_s28 }
   0xc   :  { %s84_s26 = sshll.u32 %s1980_s25, 4  ;;  %s1981_s29 = smov 64   ;;  %s85_s26 = int_to_ptr.vmem [resolvable:$true] %s84_s26 }
   0xd   :  { %s1982_s30 = smov 4   ;;  %s1983_s10 = smov [#allocation2]  }
   0xe   :  { %90 = dma.hbm_to_vmem [thread:$0]  %s83_s24, 2048, %s85_s26, [#allocation12], %s1981_s29, %s1981_s29, %s1982_s30  }
   0xf   :  { %s26_s11 = sshll.u32 %s1983_s10, 4  ;;  %s48_s14 = sshll.u32 %s2084_s2, 4  ;;  %s27_s11 = int_to_ptr.vmem [resolvable:$true] %s26_s11  ;;  %s49_s14 = int_to_ptr.hbm [resolvable:$true] %s48_s14 }
  0x10   :  { %29 = dma.hbm_to_vmem [thread:$0]  %s25_s28, 128, %s27_s11, [#allocation3]  }
  0x11   :  { %s72_s16 = sshll.u32 %s2086_s4, 4  ;;  %s1984_s17 = smov [#allocation7]   ;;  %s73_s16 = int_to_ptr.hbm [resolvable:$true] %s72_s16 }
  0x12   :  { %s50_s18 = sshll.u32 %s1984_s17, 4  ;;  %s1985_s0 = smov [#allocation10]   ;;  %s51_s18 = int_to_ptr.vmem [resolvable:$true] %s50_s18 }
  0x13   :  { %53 = dma.hbm_to_vmem [thread:$0]  %s49_s14, 64, %s51_s18, [#allocation6]  }
  0x14   :  { %s74_s19 = sshll.u32 %s1985_s0, 4  ;;  %s97_s22 = sshll.u32 %s2089_s7, 4  ;;  %s75_s19 = int_to_ptr.vmem [resolvable:$true] %s74_s19  ;;  %s98_s22 = int_to_ptr.hbm [resolvable:$true] %s97_s22 }
  0x15   :  { %77 = dma.hbm_to_vmem [thread:$0]  %s73_s16, 32, %s75_s19, [#allocation9]  }
  0x16   :  { %s1986_s2 = smov [#allocation13]  }
  0x17   :  { %s99_s1 = sshll.u32 %s1986_s2, 4  ;;  %s100_s1 = int_to_ptr.vmem [resolvable:$true] %s99_s1 }
  0x18   :  { %105 = dma.hbm_to_vmem [thread:$0]  %s98_s22, 1024, %s100_s1, [#allocation12], %s1981_s29, %s1981_s29, %s1982_s30  }
  0x19   :  { %1964 = dma.done.wait [#allocation3], 128  }
  0x1a   :  { %1965 = vsyncadd [#allocation3], 4294967168 }
  0x1b   :  { %1966 = dma.done.wait [#allocation6], 3392  }
  0x1c   :  { %1967 = vsyncadd [#allocation6], 4294963904 }
  0x1d   :  { %1968 = dma.done.wait [#allocation9], 8224  }
  0x1e   :  { %1969 = vsyncadd [#allocation9], 4294959072 }
  0x1f   :  { %1970 = dma.done.wait [#allocation12], 3072  }
  0x20   :  { %1971 = vsyncadd [#allocation12], 4294964224  ;;  %v163_v0 = vld [vmem:[#allocation5 + $0xc0] sm:$0x33]  ;;  %vm299_vm0 = vcmask 1041408   ;;  %v137_v62 = vld [vmem:[#allocation2] sm:$0xff] }
  0x21   :  { %v239_v1 = vunpack.c.l.b16 %v163_v0  ;;  %v240_v2 = vunpack.c.h.b16 %v163_v0  ;;  %v1275_v3 = vld [vmem:[#allocation5 + $0xa0] sm:$0xf]  ;;  %v1667_v5 = vld [vmem:[#allocation5 + $0xac] sm:$0xf0]  ;;  %v1665_v7 = vld [vmem:[#allocation5 + $0xa4] sm:$0xf] }
  0x22   :  { %v1277_v8 = vld [vmem:[#allocation5 + $0xb0] sm:$0xf0]  ;;  %v164_v9 = vld [vmem:[#allocation5 + $0xc8] sm:$0x33]  ;;  %v1276_v13 = vor.u32 %v1667_v5, %v1275_v3  ;;  %v1259_v14 = vld [vmem:[#allocation5 + $0x80] sm:$0xf] }
  0x23   :  { %v267_v4 = vpack.c.b16 %v239_v1, %v239_v1  ;;  %v268_v6 = vpack.c.b16 %v240_v2, %v240_v2  ;;  %v241_v12 = vunpack.c.l.b16 %v164_v9  ;;  %v1280_v15 = vor.u32 %v1665_v7, %v1277_v8  ;;  %v1663_v16 = vld [vmem:[#allocation5 + $0x8c] sm:$0xf0]  ;;  %v1661_v17 = vld [vmem:[#allocation5 + $0x84] sm:$0xf]  ;;  %v1261_v18 = vld [vmem:[#allocation5 + $0x90] sm:$0xf0] }
  0x24   :  { %v1283_v20 = vld [vmem:[#allocation5 + $0xa8] sm:$0xf]  ;;  %v1668_v21 = vld [vmem:[#allocation5 + $0xb4] sm:$0xf0]  ;;  %v1260_v23 = vor.u32 %v1663_v16, %v1259_v14  ;;  %v1243_v24 = vld [vmem:[#allocation5 + $0x60] sm:$0xf]  ;;  %v1264_v25 = vor.u32 %v1661_v17, %v1261_v18  ;;  %v242_v41 = vunpack.c.h.b16 %v164_v9  ;;  %v2063_v14 = vpack.c.bf16 %v137_v62, %v137_v62 }
  0x25   :  { %v301_v10 = vsel %vm299_vm0, %v267_v4, 0  ;;  %v304_v11 = vsel %vm299_vm0, %v268_v6, 0  ;;  %v269_v19 = vpack.c.b16 %v241_v12, %v241_v12  ;;  %v1659_v26 = vld [vmem:[#allocation5 + $0x6c] sm:$0xf0]  ;;  %v1657_v27 = vld [vmem:[#allocation5 + $0x64] sm:$0xf]  ;;  %v1284_v29 = vor.u32 %v1668_v21, %v1283_v20 }
  0x26   :  { %313 = vmatpush.bf16.msra.mxu3 %v301_v10  ;;  %326 = vmatpush.bf16.msra.mxu1 %v304_v11  ;;  %v1245_v28 = vld [vmem:[#allocation5 + $0x70] sm:$0xf0]  ;;  %v1267_v30 = vld [vmem:[#allocation5 + $0x88] sm:$0xf]  ;;  %v1664_v31 = vld [vmem:[#allocation5 + $0x94] sm:$0xf0]  ;;  %v1244_v32 = vor.u32 %v1659_v26, %v1243_v24  ;;  %v270_v51 = vpack.c.b16 %v242_v41, %v242_v41 }
  0x27   :  { %v307_v22 = vsel %vm299_vm0, %v269_v19, 0  ;;  %v1227_v33 = vld [vmem:[#allocation5 + $0x40] sm:$0xf]  ;;  %v1248_v34 = vor.u32 %v1657_v27, %v1245_v28  ;;  %v1655_v35 = vld [vmem:[#allocation5 + $0x4c] sm:$0xf0]  ;;  %v1268_v38 = vor.u32 %v1664_v31, %v1267_v30  ;;  %vm295_vm1 = vcmask 818176  }
  0x28   :  { %339 = vmatpush.bf16.msra.mxu2 %v307_v22  ;;  %v1653_v36 = vld [vmem:[#allocation5 + $0x44] sm:$0xf]  ;;  %v1229_v37 = vld [vmem:[#allocation5 + $0x50] sm:$0xf0]  ;;  %v1251_v39 = vld [vmem:[#allocation5 + $0x68] sm:$0xf]  ;;  %v1228_v42 = vor.u32 %v1655_v35, %v1227_v33 }
  0x29   :  { %v1660_v40 = vld [vmem:[#allocation5 + $0x74] sm:$0xf0]  ;;  %v1211_v43 = vld [vmem:[#allocation5 + $0x20] sm:$0xf]  ;;  %v1232_v44 = vor.u32 %v1653_v36, %v1229_v37  ;;  %v1651_v45 = vld [vmem:[#allocation5 + $0x2c] sm:$0xf0] }
  0x2a   :  { %314 = vmatpush.bf16.msra.mxu3 %v1276_v13  ;;  %327 = vmatpush.bf16.msra.mxu1 %v1280_v15  ;;  %v1649_v46 = vld [vmem:[#allocation5 + $0x24] sm:$0xf]  ;;  %v1213_v47 = vld [vmem:[#allocation5 + $0x30] sm:$0xf0]  ;;  %v1252_v48 = vor.u32 %v1660_v40, %v1251_v39  ;;  %v1235_v49 = vld [vmem:[#allocation5 + $0x48] sm:$0xf]  ;;  %v1212_v52 = vor.u32 %v1651_v45, %v1211_v43 }
  0x2b   :  { %v1656_v50 = vld [vmem:[#allocation5 + $0x54] sm:$0xf0]  ;;  %v1195_v53 = vld [vmem:[#allocation5] sm:$0xf]  ;;  %v1216_v54 = vor.u32 %v1649_v46, %v1213_v47  ;;  %v1647_v55 = vld [vmem:[#allocation5 + $0xc] sm:$0xf0] }
  0x2c   :  { %340 = vmatpush.bf16.msra.mxu2 %v1284_v29  ;;  %v1645_v56 = vld [vmem:[#allocation5 + $0x4] sm:$0xf]  ;;  %v1197_v57 = vld [vmem:[#allocation5 + $0x10] sm:$0xf0]  ;;  %v1236_v58 = vor.u32 %v1656_v50, %v1235_v49  ;;  %v1219_v59 = vld [vmem:[#allocation5 + $0x28] sm:$0xf]  ;;  %v1196_v63 = vor.u32 %v1647_v55, %v1195_v53 }
  0x2d   :  { %v1652_v60 = vld [vmem:[#allocation5 + $0x34] sm:$0xf0]  ;;  %v310_v61 = vsel %vm299_vm0, %v270_v51, 0  ;;  %v1666_v0 = vld [vmem:[#allocation5 + $0xac] sm:$0xf]  ;;  %v1200_v1 = vor.u32 %v1645_v56, %v1197_v57  ;;  %s1987_s25 = smov [#allocation14]  }
  0x2e   :  { %315 = vmatpush.bf16.msra.mxu3 %v1260_v23  ;;  %328 = vmatpush.bf16.msra.mxu1 %v1264_v25  ;;  %v1351_v2 = vld [vmem:[#allocation8 + $0x70] sm:$0xf]  ;;  %v1684_v3 = vld [vmem:[#allocation8 + $0x74] sm:$0xf0]  ;;  %v1220_v5 = vor.u32 %v1652_v60, %v1219_v59  ;;  %v1343_v8 = vld [vmem:[#allocation8 + $0x60] sm:$0xf] }
  0x2f   :  { %v1415_v4 = vld [vmem:[#allocation8 + $0xf0] sm:$0xf]  ;;  %v1352_v6 = vor.u32 %v1684_v3, %v1351_v2  ;;  %v1700_v7 = vld [vmem:[#allocation8 + $0xf4] sm:$0xf0]  ;;  %v1682_v9 = vld [vmem:[#allocation8 + $0x64] sm:$0xf0] }
  0x30   :  { %341 = vmatpush.bf16.msra.mxu2 %v1268_v38  ;;  %v1285_v10 = vld [vmem:[#allocation5 + $0xb8] sm:$0xf0]  ;;  %v1203_v11 = vld [vmem:[#allocation5 + $0x8] sm:$0xf]  ;;  %v1648_v12 = vld [vmem:[#allocation5 + $0x14] sm:$0xf0]  ;;  %v1416_v13 = vor.u32 %v1700_v7, %v1415_v4  ;;  %v1344_v17 = vor.u32 %v1682_v9, %v1343_v8 }
  0x31   :  { %795 = vmatpush.bf16.msra.mxu0 %v1352_v6  ;;  %v1407_v15 = vld [vmem:[#allocation8 + $0xe0] sm:$0xf]  ;;  %v1698_v16 = vld [vmem:[#allocation8 + $0xe4] sm:$0xf0]  ;;  %v1288_v18 = vor.u32 %v1666_v0, %v1285_v10  ;;  %v1204_v19 = vor.u32 %v1648_v12, %v1203_v11  ;;  %v1335_v20 = vld [vmem:[#allocation8 + $0x50] sm:$0xf] }
  0x32   :  { %316 = vmatpush.bf16.msra.mxu3 %v1244_v32  ;;  %329 = vmatpush.bf16.msra.mxu1 %v1248_v34  ;;  %v1680_v21 = vld [vmem:[#allocation8 + $0x54] sm:$0xf0]  ;;  %v1269_v23 = vld [vmem:[#allocation5 + $0x98] sm:$0xf0]  ;;  %v1408_v24 = vor.u32 %v1698_v16, %v1407_v15  ;;  %v1399_v25 = vld [vmem:[#allocation8 + $0xd0] sm:$0xf] }
  0x33   :  { %v1662_v22 = vld [vmem:[#allocation5 + $0x8c] sm:$0xf]  ;;  %v1336_v27 = vor.u32 %v1680_v21, %v1335_v20  ;;  %v1327_v28 = vld [vmem:[#allocation8 + $0x40] sm:$0xf]  ;;  %v1678_v30 = vld [vmem:[#allocation8 + $0x44] sm:$0xf0] }
  0x34   :  { %342 = vmatpush.bf16.msra.mxu2 %v1252_v48  ;;  %v1696_v26 = vld [vmem:[#allocation8 + $0xd4] sm:$0xf0]  ;;  %v1272_v29 = vor.u32 %v1662_v22, %v1269_v23  ;;  %v1479_v31 = vld [vmem:[#allocation8 + $0x170] sm:$0xf]  ;;  %v1253_v34 = vld [vmem:[#allocation5 + $0x78] sm:$0xf0]  ;;  %v1328_v39 = vor.u32 %v1678_v30, %v1327_v28 }
  0x35   :  { %796 = vmatpush.bf16.msra.mxu0 %v1344_v17  ;;  %v1716_v32 = vld [vmem:[#allocation8 + $0x174] sm:$0xf0]  ;;  %v1400_v35 = vor.u32 %v1696_v26, %v1399_v25  ;;  %v1391_v37 = vld [vmem:[#allocation8 + $0xc0] sm:$0xf]  ;;  %v1694_v38 = vld [vmem:[#allocation8 + $0xc4] sm:$0xf0] }
  0x36   :  { %317 = vmatpush.bf16.msra.mxu3 %v1228_v42  ;;  %330 = vmatpush.bf16.msra.mxu1 %v1232_v44  ;;  %v1658_v33 = vld [vmem:[#allocation5 + $0x6c] sm:$0xf]  ;;  %v1480_v36 = vor.u32 %v1716_v32, %v1479_v31  ;;  %v1471_v40 = vld [vmem:[#allocation8 + $0x160] sm:$0xf]  ;;  %v1714_v41 = vld [vmem:[#allocation8 + $0x164] sm:$0xf0]  ;;  %v1392_v48 = vor.u32 %v1694_v38, %v1391_v37 }
  0x37   :  { %v1256_v42 = vor.u32 %v1658_v33, %v1253_v34  ;;  %v1319_v43 = vld [vmem:[#allocation8 + $0x30] sm:$0xf]  ;;  %v1676_v44 = vld [vmem:[#allocation8 + $0x34] sm:$0xf0]  ;;  %v1472_v45 = vor.u32 %v1714_v41, %v1471_v40  ;;  %v1237_v47 = vld [vmem:[#allocation5 + $0x58] sm:$0xf0] }
  0x38   :  { %343 = vmatpush.bf16.msra.mxu2 %v1236_v58  ;;  %v1654_v46 = vld [vmem:[#allocation5 + $0x4c] sm:$0xf]  ;;  %v1383_v49 = vld [vmem:[#allocation8 + $0xb0] sm:$0xf]  ;;  %v1320_v51 = vor.u32 %v1676_v44, %v1319_v43  ;;  %v1311_v53 = vld [vmem:[#allocation8 + $0x20] sm:$0xf] }
  0x39   :  { %797 = vmatpush.bf16.msra.mxu0 %v1336_v27  ;;  %v1692_v50 = vld [vmem:[#allocation8 + $0xb4] sm:$0xf0]  ;;  %v1221_v56 = vld [vmem:[#allocation5 + $0x38] sm:$0xf0]  ;;  %v1375_v58 = vld [vmem:[#allocation8 + $0xa0] sm:$0xf] }
  0x3a   :  { %318 = vmatpush.bf16.msra.mxu3 %v1212_v52  ;;  %331 = vmatpush.bf16.msra.mxu1 %v1216_v54  ;;  %v1240_v52 = vor.u32 %v1654_v46, %v1237_v47  ;;  %v1674_v54 = vld [vmem:[#allocation8 + $0x24] sm:$0xf0]  ;;  %v1650_v55 = vld [vmem:[#allocation5 + $0x2c] sm:$0xf]  ;;  %v1384_v57 = vor.u32 %v1692_v50, %v1383_v49  ;;  %v1303_v62 = vld [vmem:[#allocation8 + $0x10] sm:$0xf] }
  0x3b   :  { %v1690_v59 = vld [vmem:[#allocation8 + $0xa4] sm:$0xf0]  ;;  %v1312_v60 = vor.u32 %v1674_v54, %v1311_v53  ;;  %v1646_v0 = vld [vmem:[#allocation5 + $0xc] sm:$0xf]  ;;  %v1367_v3 = vld [vmem:[#allocation8 + $0x90] sm:$0xf] }
  0x3c   :  { %344 = vmatpush.bf16.msra.mxu2 %v1220_v5  ;;  %v1376_v2 = vor.u32 %v1690_v59, %v1375_v58  ;;  %v1688_v4 = vld [vmem:[#allocation8 + $0x94] sm:$0xf0]  ;;  %v1543_v5 = vld [vmem:[#allocation8 + $0x1f0] sm:$0xf]  ;;  %v1295_v9 = vld [vmem:[#allocation8] sm:$0xf] }
  0x3d   :  { %798 = vmatpush.bf16.msra.mxu0 %v1328_v39  ;;  %v1732_v6 = vld [vmem:[#allocation8 + $0x1f4] sm:$0xf0]  ;;  %v1670_v10 = vld [vmem:[#allocation8 + $0x4] sm:$0xf0]  ;;  %v1368_v11 = vor.u32 %v1688_v4, %v1367_v3  ;;  %v1683_v15 = vld [vmem:[#allocation8 + $0x74] sm:$0xf] }
  0x3e   :  { %319 = vmatpush.bf16.msra.mxu3 %v1196_v63  ;;  %332 = vmatpush.bf16.msra.mxu1 %v1200_v1  ;;  %v1672_v63 = vld [vmem:[#allocation8 + $0x14] sm:$0xf0]  ;;  %v1205_v1 = vld [vmem:[#allocation5 + $0x18] sm:$0xf0]  ;;  %v1544_v12 = vor.u32 %v1732_v6, %v1543_v5  ;;  %v1353_v16 = vld [vmem:[#allocation8 + $0x78] sm:$0xf0]  ;;  %v1296_v20 = vor.u32 %v1670_v10, %v1295_v9 }
  0x3f   :  { %v1304_v7 = vor.u32 %v1672_v63, %v1303_v62  ;;  %v1208_v8 = vor.u32 %v1646_v0, %v1205_v1  ;;  %v1686_v17 = vld [vmem:[#allocation8 + $0x84] sm:$0xf0]  ;;  %v1699_v21 = vld [vmem:[#allocation8 + $0xf4] sm:$0xf]  ;;  %v1417_v22 = vld [vmem:[#allocation8 + $0xf8] sm:$0xf0]  ;;  %v1356_v23 = vor.u32 %v1683_v15, %v1353_v16 }
  0x40   :  { %345 = vmatpush.bf16.msra.mxu2 %v1204_v19  ;;  %v1730_v19 = vld [vmem:[#allocation8 + $0x1e4] sm:$0xf0]  ;;  %v1420_v26 = vor.u32 %v1699_v21, %v1417_v22  ;;  %v366_v27 = vld [vmem:[#allocation7] sm:$0xf]  ;;  %v1463_v28 = vld [vmem:[#allocation8 + $0x150] sm:$0xf] }
  0x41   :  { %1289 = vmatmul.msk.bf16.vlgmr.msra.gmra.mxu3 %vm295_vm1, %v2063_v14  ;;  %1290 = vmatmul.msk.bf16.vlgmr.msra.gmra.mxu1 %vm295_vm1, %v2063_v14  ;;  %368 = vst [vmem:[#allocation1] ss:$9 sm:$0xff] %v366_v27  ;;  %v1527_v30 = vld [vmem:[#allocation8 + $0x1d0] sm:$0xf]  ;;  %v1728_v32 = vld [vmem:[#allocation8 + $0x1d4] sm:$0xf0] }
  0x42   :  { %352 = vmatpush.bf16.msrb.mxu3 %v310_v61  ;;  %808 = vmatpush.bf16.msrb.mxu1 %v1416_v13  ;;  %v1224_v61 = vor.u32 %v1650_v55, %v1221_v56  ;;  %v1359_v13 = vld [vmem:[#allocation8 + $0x80] sm:$0xf]  ;;  %v1681_v33 = vld [vmem:[#allocation8 + $0x64] sm:$0xf]  ;;  %v1528_v34 = vor.u32 %v1728_v32, %v1527_v30  ;;  %v1409_v37 = vld [vmem:[#allocation8 + $0xe8] sm:$0xf0] }
  0x43   :  { %1291 = vmatmul.msk.bf16.vlgmr.msra.gmra.mxu2 %vm295_vm1, %v2063_v14  ;;  %799 = vmatpush.bf16.msra.mxu0 %v1320_v51  ;;  %v1455_v39 = vld [vmem:[#allocation8 + $0x140] sm:$0xf]  ;;  %v1710_v40 = vld [vmem:[#allocation8 + $0x144] sm:$0xf0]  ;;  %v1679_v44 = vld [vmem:[#allocation8 + $0x54] sm:$0xf] }
  0x44   :  { %821 = vmatpush.bf16.msrb.mxu2 %v1480_v36  ;;  %v1697_v36 = vld [vmem:[#allocation8 + $0xe4] sm:$0xf]  ;;  %v1456_v41 = vor.u32 %v1710_v40, %v1455_v39  ;;  %v1726_v43 = vld [vmem:[#allocation8 + $0x1c4] sm:$0xf0]  ;;  %v1337_v46 = vld [vmem:[#allocation8 + $0x58] sm:$0xf0] }
  0x45   :  { %v1695_v47 = vld [vmem:[#allocation8 + $0xd4] sm:$0xf]  ;;  %v1340_v49 = vor.u32 %v1679_v44, %v1337_v46  ;;  %v1447_v51 = vld [vmem:[#allocation8 + $0x130] sm:$0xf]  ;;  %v1724_v55 = vld [vmem:[#allocation8 + $0x1b4] sm:$0xf0] }
  0x46   :  { %353 = vmatpush.bf16.msrb.mxu3 %v1288_v18  ;;  %809 = vmatpush.bf16.msrb.mxu1 %v1408_v24  ;;  %v1535_v18 = vld [vmem:[#allocation8 + $0x1e0] sm:$0xf]  ;;  %v1360_v24 = vor.u32 %v1686_v17, %v1359_v13  ;;  %v1511_v53 = vld [vmem:[#allocation8 + $0x1b0] sm:$0xf]  ;;  %v1677_v56 = vld [vmem:[#allocation8 + $0x44] sm:$0xf] }
  0x47   :  { %800 = vmatpush.bf16.msra.mxu0 %v1312_v60  ;;  %v1536_v25 = vor.u32 %v1730_v19, %v1535_v18  ;;  %v1512_v58 = vor.u32 %v1724_v55, %v1511_v53  ;;  %v1693_v60 = vld [vmem:[#allocation8 + $0xc4] sm:$0xf]  ;;  %v1439_v63 = vld [vmem:[#allocation8 + $0x120] sm:$0xf]  ;;  %v1706_v0 = vld [vmem:[#allocation8 + $0x124] sm:$0xf0] }
  0x48   :  { %822 = vmatpush.bf16.msrb.mxu2 %v1472_v45  ;;  %v1503_v1 = vld [vmem:[#allocation8 + $0x1a0] sm:$0xf]  ;;  %v1722_v3 = vld [vmem:[#allocation8 + $0x1a4] sm:$0xf0]  ;;  %v1675_v4 = vld [vmem:[#allocation8 + $0x34] sm:$0xf] }
  0x49   :  { %v1321_v5 = vld [vmem:[#allocation8 + $0x38] sm:$0xf0]  ;;  %v1504_v6 = vor.u32 %v1722_v3, %v1503_v1  ;;  %v1431_v10 = vld [vmem:[#allocation8 + $0x110] sm:$0xf]  ;;  %v1720_v15 = vld [vmem:[#allocation8 + $0x194] sm:$0xf0] }
  0x4a   :  { %354 = vmatpush.bf16.msrb.mxu3 %v1272_v29  ;;  %810 = vmatpush.bf16.msrb.mxu1 %v1400_v35  ;;  %v1712_v29 = vld [vmem:[#allocation8 + $0x154] sm:$0xf0]  ;;  %v1345_v35 = vld [vmem:[#allocation8 + $0x68] sm:$0xf0]  ;;  %v1385_v9 = vld [vmem:[#allocation8 + $0xb8] sm:$0xf0] }
  0x4b   :  { %801 = vmatpush.bf16.msra.mxu0 %v1304_v7  ;;  %v1464_v31 = vor.u32 %v1712_v29, %v1463_v28  ;;  %v1348_v38 = vor.u32 %v1681_v33, %v1345_v35  ;;  %v1324_v7 = vor.u32 %v1675_v4, %v1321_v5  ;;  %v1495_v13 = vld [vmem:[#allocation8 + $0x190] sm:$0xf]  ;;  %v1673_v18 = vld [vmem:[#allocation8 + $0x24] sm:$0xf]  ;;  %v1313_v19 = vld [vmem:[#allocation8 + $0x28] sm:$0xf0] }
  0x4c   :  { %v1496_v17 = vor.u32 %v1720_v15, %v1495_v13  ;;  %v1316_v21 = vor.u32 %v1673_v18, %v1313_v19  ;;  %v1377_v22 = vld [vmem:[#allocation8 + $0xa8] sm:$0xf0]  ;;  %v1718_v27 = vld [vmem:[#allocation8 + $0x184] sm:$0xf0]  ;;  %v1671_v28 = vld [vmem:[#allocation8 + $0x14] sm:$0xf] }
  0x4d   :  { %823 = vmatpush.bf16.msrb.mxu2 %v1464_v31  ;;  %v1305_v30 = vld [vmem:[#allocation8 + $0x18] sm:$0xf0]  ;;  %v1687_v31 = vld [vmem:[#allocation8 + $0x94] sm:$0xf]  ;;  %v1669_v40 = vld [vmem:[#allocation8 + $0x4] sm:$0xf] }
  0x4e   :  { %355 = vmatpush.bf16.msrb.mxu3 %v1256_v42  ;;  %811 = vmatpush.bf16.msrb.mxu1 %v1392_v48  ;;  %v1519_v42 = vld [vmem:[#allocation8 + $0x1c0] sm:$0xf]  ;;  %v1401_v48 = vld [vmem:[#allocation8 + $0xd8] sm:$0xf0]  ;;  %v1361_v44 = vld [vmem:[#allocation8 + $0x88] sm:$0xf0] }
  0x4f   :  { %802 = vmatpush.bf16.msra.mxu0 %v1296_v20  ;;  %v1520_v45 = vor.u32 %v1726_v43, %v1519_v42  ;;  %v1404_v50 = vor.u32 %v1695_v47, %v1401_v48  ;;  %v1689_v20 = vld [vmem:[#allocation8 + $0xa4] sm:$0xf]  ;;  %v1369_v32 = vld [vmem:[#allocation8 + $0x98] sm:$0xf0]  ;;  %v1297_v42 = vld [vmem:[#allocation8 + $0x8] sm:$0xf0] }
  0x50   :  { %v1481_v35 = vld [vmem:[#allocation8 + $0x178] sm:$0xf0]  ;;  %v1685_v43 = vld [vmem:[#allocation8 + $0x84] sm:$0xf]  ;;  %v1300_v47 = vor.u32 %v1669_v40, %v1297_v42  ;;  %v1537_v53 = vld [vmem:[#allocation8 + $0x1e8] sm:$0xf0] }
  0x51   :  { %824 = vmatpush.bf16.msrb.mxu2 %v1456_v41  ;;  %v1545_v39 = vld [vmem:[#allocation8 + $0x1f8] sm:$0xf0]  ;;  %v1364_v48 = vor.u32 %v1685_v43, %v1361_v44  ;;  %v1457_v3 = vld [vmem:[#allocation8 + $0x148] sm:$0xf0]  ;;  %v1725_v4 = vld [vmem:[#allocation8 + $0x1c4] sm:$0xf] }
  0x52   :  { %356 = vmatpush.bf16.msrb.mxu3 %v1240_v52  ;;  %812 = vmatpush.bf16.msrb.mxu1 %v1384_v57  ;;  %v1708_v52 = vld [vmem:[#allocation8 + $0x134] sm:$0xf0]  ;;  %v1329_v57 = vld [vmem:[#allocation8 + $0x48] sm:$0xf0]  ;;  %v369_v46 = vld [vmem:[#allocation1] sm:$0xff]  ;;  %s1180_s3 = sshll.u32 %s2091_s9, 4  ;;  %s1181_s3 = int_to_ptr.hbm [resolvable:$true] %s1180_s3 }
  0x53   :  { %847 = vmatpush.bf16.msrb.mxu0 %v1356_v23  ;;  %v1448_v54 = vor.u32 %v1708_v52, %v1447_v51  ;;  %v1332_v59 = vor.u32 %v1677_v56, %v1329_v57  ;;  %v1423_v23 = vld [vmem:[#allocation8 + $0x100] sm:$0xf]  ;;  %v1729_v51 = vld [vmem:[#allocation8 + $0x1e4] sm:$0xf]  ;;  %v373_v56 = vpack.i.b16 %v369_v46, %v369_v46  ;;  %v372_v13 = vld [vmem:[#allocation1 + $0x1b] sm:$0xff] }
  0x54   :  { %v900_v15 = vld [vmem:[#allocation10] sm:$0x3]  ;;  %v1449_v18 = vld [vmem:[#allocation8 + $0x138] sm:$0xf0]  ;;  %v1701_v43 = vld [vmem:[#allocation8 + $0x104] sm:$0xf] }
  0x55   :  { %825 = vmatpush.bf16.msrb.mxu2 %v1448_v54  ;;  %v1540_v54 = vor.u32 %v1729_v51, %v1537_v53  ;;  %v375_v1 = vperm.slane %v373_v56, 0  ;;  %v1497_v42 = vld [vmem:[#allocation8 + $0x198] sm:$0xf0]  ;;  %v1425_v44 = vld [vmem:[#allocation8 + $0x108] sm:$0xf0] }
  0x56   :  { %357 = vmatpush.bf16.msrb.mxu3 %v1224_v61  ;;  %813 = vmatpush.bf16.msrb.mxu1 %v1376_v2  ;;  %v1393_v61 = vld [vmem:[#allocation8 + $0xc8] sm:$0xf0]  ;;  %v1440_v2 = vor.u32 %v1706_v0, %v1439_v63 }
  0x57   :  { %848 = vmatpush.bf16.msrb.mxu0 %v1348_v38  ;;  %v1396_v62 = vor.u32 %v1693_v60, %v1393_v61  ;;  %v1372_v38 = vor.u32 %v1687_v31, %v1369_v32  ;;  %v1727_v61 = vld [vmem:[#allocation8 + $0x1d4] sm:$0xf]  ;;  %v1721_v31 = vld [vmem:[#allocation8 + $0x1a4] sm:$0xf]  ;;  %v1505_v32 = vld [vmem:[#allocation8 + $0x1a8] sm:$0xf0] }
  0x59   :  { %826 = vmatpush.bf16.msrb.mxu2 %v1440_v2  ;;  %v1709_v2 = vld [vmem:[#allocation8 + $0x144] sm:$0xf] }
  0x5a   :  { %358 = vmatpush.bf16.msrb.mxu3 %v1208_v8  ;;  %814 = vmatpush.bf16.msrb.mxu1 %v1368_v11  ;;  %v1691_v8 = vld [vmem:[#allocation8 + $0xb4] sm:$0xf]  ;;  %v1460_v5 = vor.u32 %v1709_v2, %v1457_v3 }
  0x5b   :  { %849 = vmatpush.bf16.msrb.mxu0 %v1340_v49  ;;  %v1388_v11 = vor.u32 %v1691_v8, %v1385_v9  ;;  %v1713_v49 = vld [vmem:[#allocation8 + $0x164] sm:$0xf] }
  0x5d   :  { %1292 = vmatmul.msk.bf16.vlgmr.msrb.gmra.mxu3 %vm295_vm1, %v2063_v14  ;;  %v1412_v14 = vor.u32 %v1697_v36, %v1409_v37  ;;  %v1731_v36 = vld [vmem:[#allocation8 + $0x1f4] sm:$0xf]  ;;  %v1308_v37 = vor.u32 %v1671_v28, %v1305_v30 }
  0x5e   :  { %834 = vmatpush.bf16.msra.mxu3 %v1544_v12  ;;  %815 = vmatpush.bf16.msrb.mxu1 %v1360_v24  ;;  %v1704_v12 = vld [vmem:[#allocation8 + $0x114] sm:$0xf0]  ;;  %v1702_v24 = vld [vmem:[#allocation8 + $0x104] sm:$0xf0]  ;;  %v1548_v41 = vor.u32 %v1731_v36, %v1545_v39 }
  0x5f   :  { %850 = vmatpush.bf16.msrb.mxu0 %v1332_v59  ;;  %v1432_v16 = vor.u32 %v1704_v12, %v1431_v10  ;;  %v1424_v29 = vor.u32 %v1702_v24, %v1423_v23  ;;  %v1465_v59 = vld [vmem:[#allocation8 + $0x158] sm:$0xf0]  ;;  %v371_v12 = vld [vmem:[#allocation1 + $0x12] sm:$0xff] }
  0x60   :  { %v1513_v23 = vld [vmem:[#allocation8 + $0x1b8] sm:$0xf0]  ;;  %v379_v51 = vpack.i.b16 %v371_v12, %v371_v12  ;;  %v1737_v12 = vld [vmem:[#allocation11 + $0x20] sm:$0xff] }
  0x61   :  { %827 = vmatpush.bf16.msrb.mxu2 %v1432_v16 }
  0x62   :  { %835 = vmatpush.bf16.msra.mxu3 %v1536_v25  ;;  %860 = vmatpush.bf16.msra.mxu1 %v1420_v26  ;;  %v1380_v25 = vor.u32 %v1689_v20, %v1377_v22  ;;  %v1487_v26 = vld [vmem:[#allocation8 + $0x180] sm:$0xf]  ;;  %v1723_v22 = vld [vmem:[#allocation8 + $0x1b4] sm:$0xf]  ;;  %v381_v53 = vperm.slane %v379_v51, 0 }
  0x63   :  { %851 = vmatpush.bf16.msrb.mxu0 %v1324_v7  ;;  %v1488_v33 = vor.u32 %v1718_v27, %v1487_v26  ;;  %v1516_v24 = vor.u32 %v1723_v22, %v1513_v23  ;;  %v1441_v26 = vld [vmem:[#allocation8 + $0x128] sm:$0xf0]  ;;  %v1743_v22 = vld [vmem:[#allocation11 + $0x50] sm:$0xff] }
  0x64   :  { %v1734_v23 = vld [vmem:[#allocation11 + $0x8] sm:$0xff] }
  0x65   :  { %828 = vmatpush.bf16.msrb.mxu2 %v1424_v29 }
  0x66   :  { %836 = vmatpush.bf16.msra.mxu3 %v1528_v34  ;;  %861 = vmatpush.bf16.msra.mxu1 %v1412_v14  ;;  %v1715_v34 = vld [vmem:[#allocation8 + $0x174] sm:$0xf] }
  0x67   :  { %852 = vmatpush.bf16.msrb.mxu0 %v1316_v21  ;;  %v1484_v14 = vor.u32 %v1715_v34, %v1481_v35  ;;  %v1433_v34 = vld [vmem:[#allocation8 + $0x118] sm:$0xf0] }
  0x69   :  { %873 = vmatpush.bf16.msra.mxu2 %v1484_v14 }
  0x6a   :  { %837 = vmatpush.bf16.msra.mxu3 %v1520_v45  ;;  %862 = vmatpush.bf16.msra.mxu1 %v1404_v50  ;;  %v370_v45 = vld [vmem:[#allocation1 + $0x9] sm:$0xff] }
  0x6b   :  { %853 = vmatpush.bf16.msrb.mxu0 %v1308_v37  ;;  %v1473_v50 = vld [vmem:[#allocation8 + $0x168] sm:$0xf0]  ;;  %v376_v55 = vpack.i.b16 %v370_v45, %v370_v45  ;;  %902 = vst [vmem:[#allocation1] ss:$9 sm:$0xff] %v900_v15 }
  0x6c   :  { %v1476_v52 = vor.u32 %v1713_v49, %v1473_v50  ;;  %v1489_v49 = vld [vmem:[#allocation8 + $0x188] sm:$0xf0] }
  0x6d   :  { %v378_v0 = vperm.slane %v376_v55, 0 }
  0x6e   :  { %838 = vmatpush.bf16.msra.mxu3 %v1512_v58  ;;  %863 = vmatpush.bf16.msra.mxu1 %v1396_v62  ;;  %v1711_v58 = vld [vmem:[#allocation8 + $0x154] sm:$0xf]  ;;  %v1529_v62 = vld [vmem:[#allocation8 + $0x1d8] sm:$0xf0] }
  0x6f   :  { %874 = vmatpush.bf16.msra.mxu2 %v1476_v52  ;;  %854 = vmatpush.bf16.msrb.mxu0 %v1300_v47  ;;  %v1468_v60 = vor.u32 %v1711_v58, %v1465_v59  ;;  %v1532_v63 = vor.u32 %v1727_v61, %v1529_v62  ;;  %v390_v10 = vunpack.c.l.bf16 %v378_v0  ;;  %v1428_v47 = vor.u32 %v1701_v43, %v1425_v44 }
  0x70   :  { %v382_v52 = vpack.i.b16 %v372_v13, %v372_v13  ;;  %v1745_v13 = vld [vmem:[#allocation11 + $0x60] sm:$0xff] }
  0x72   :  { %839 = vmatpush.bf16.msra.mxu3 %v1504_v6  ;;  %864 = vmatpush.bf16.msra.mxu1 %v1388_v11  ;;  %v1521_v6 = vld [vmem:[#allocation8 + $0x1c8] sm:$0xf0]  ;;  %v389_v11 = vunpack.c.l.bf16 %v375_v1 }
  0x73   :  { %875 = vmatpush.bf16.msra.mxu2 %v1468_v60  ;;  %v1524_v8 = vor.u32 %v1725_v4, %v1521_v6  ;;  %v1740_v4 = vld [vmem:[#allocation11 + $0x38] sm:$0xff] }
  0x76   :  { %840 = vmatpush.bf16.msra.mxu3 %v1496_v17  ;;  %865 = vmatpush.bf16.msra.mxu1 %v1380_v25  ;;  %v1707_v17 = vld [vmem:[#allocation8 + $0x134] sm:$0xf]  ;;  %v1705_v25 = vld [vmem:[#allocation8 + $0x124] sm:$0xf] }
  0x77   :  { %876 = vmatpush.bf16.msra.mxu2 %v1460_v5  ;;  %v1452_v21 = vor.u32 %v1707_v17, %v1449_v18  ;;  %v1444_v30 = vor.u32 %v1705_v25, %v1441_v26  ;;  %v1748_v5 = vld [vmem:[#allocation11 + $0x78] sm:$0xff] }
  0x78   :  { %v1736_v17 = vld [vmem:[#allocation11 + $0x18] sm:$0xff] }
  0x79   :  { %v1744_v18 = vld [vmem:[#allocation11 + $0x58] sm:$0xff] }
  0x7a   :  { %841 = vmatpush.bf16.msra.mxu3 %v1488_v33  ;;  %866 = vmatpush.bf16.msra.mxu1 %v1372_v38  ;;  %v1703_v33 = vld [vmem:[#allocation8 + $0x114] sm:$0xf]  ;;  %v1508_v38 = vor.u32 %v1721_v31, %v1505_v32 }
  0x7b   :  { %877 = vmatpush.bf16.msra.mxu2 %v1452_v21  ;;  %v1436_v40 = vor.u32 %v1703_v33, %v1433_v34  ;;  %v1735_v21 = vld [vmem:[#allocation11 + $0x10] sm:$0xff]  ;;  %v1754_v33 = vld [vmem:[#allocation13 + $0x28] sm:$0xff] }
  0x7c   :  { %v1755_v32 = vld [vmem:[#allocation13 + $0x30] sm:$0xff] }
  0x7e   :  { %886 = vmatpush.bf16.msrb.mxu3 %v1548_v41  ;;  %867 = vmatpush.bf16.msra.mxu1 %v1364_v48  ;;  %v1719_v41 = vld [vmem:[#allocation8 + $0x194] sm:$0xf]  ;;  %v1717_v48 = vld [vmem:[#allocation8 + $0x184] sm:$0xf] }
  0x7f   :  { %878 = vmatpush.bf16.msra.mxu2 %v1444_v30  ;;  %v1500_v45 = vor.u32 %v1719_v41, %v1497_v42  ;;  %v1492_v50 = vor.u32 %v1717_v48, %v1489_v49  ;;  %v1752_v41 = vld [vmem:[#allocation13 + $0x18] sm:$0xff] }
  0x82   :  { %887 = vmatpush.bf16.msrb.mxu3 %v1540_v54  ;;  %v384_v54 = vperm.slane %v382_v52, 0 }
  0x83   :  { %879 = vmatpush.bf16.msra.mxu2 %v1436_v40 }
  0x84   :  { %v392_v58 = vunpack.c.l.bf16 %v384_v54 }
  0x86   :  { %888 = vmatpush.bf16.msrb.mxu3 %v1532_v63 }
  0x87   :  { %880 = vmatpush.bf16.msra.mxu2 %v1428_v47 }
  0x8a   :  { %889 = vmatpush.bf16.msrb.mxu3 %v1524_v8  ;;  %v1739_v8 = vld [vmem:[#allocation11 + $0x30] sm:$0xff] }
  0x8e   :  { %890 = vmatpush.bf16.msrb.mxu3 %v1516_v24  ;;  %v1742_v24 = vld [vmem:[#allocation11 + $0x48] sm:$0xff] }
  0x92   :  { %891 = vmatpush.bf16.msrb.mxu3 %v1508_v38  ;;  %v904_v38 = vld [vmem:[#allocation1 + $0x9] sm:$0xff] }
  0x93   :  { %v908_v40 = vpack.i.b16 %v904_v38, %v904_v38 }
  0x95   :  { %v910_v48 = vperm.slane %v908_v40, 0 }
  0x96   :  { %892 = vmatpush.bf16.msrb.mxu3 %v1500_v45 }
  0x9a   :  { %893 = vmatpush.bf16.msrb.mxu3 %v1492_v50 }
  0xbe   :  { %v334_v57 = vpop.f32.mrf.mxu1 }
  0xc4   :  { %v321_v7 = vpop.f32.mrf.mxu3 }
  0xc5   :  { %v364_v9 = vpack.c.bf16 %v334_v57, %v321_v7  ;;  %v391_v57 = vunpack.c.l.bf16 %v381_v53  ;;  %v914_v53 = vunpack.c.l.bf16 %v910_v48 }
  0xc6   :  { %v336_v16 = vpop.f32.mrf.mxu1  ;;  %v347_v29 = vpop.f32.mrf.mxu2 }
  0xc7   :  { %v385_v19 = vunpack.c.l.bf16 %v364_v9  ;;  %v386_v20 = vunpack.c.h.bf16 %v364_v9  ;;  %v1747_v9 = vld [vmem:[#allocation11 + $0x70] sm:$0xff] }
  0xc9   :  { %v394_v27 = vadd.f32 %v390_v10, %v386_v20  ;;  %v393_v28 = vadd.f32 %v389_v11, %v385_v19  ;;  %v1738_v10 = vld [vmem:[#allocation11 + $0x28] sm:$0xff] }
  0xca   :  { %v1746_v11 = vld [vmem:[#allocation11 + $0x68] sm:$0xff] }
  0xcb   :  { %v403_v35 = vmax.f32 %v393_v28, 0.0  ;;  %v404_v36 = vmax.f32 %v394_v27, 0.0  ;;  %v1733_v27 = vld [vmem:[#allocation11] sm:$0xff] }
  0xcc   :  { %v323_v37 = vpop.f32.mrf.mxu3  ;;  %v1741_v28 = vld [vmem:[#allocation11 + $0x40] sm:$0xff] }
  0xcd   :  { %v407_v14 = vpack.c.bf16 %v403_v35, %v403_v35  ;;  %v408_v39 = vpack.c.bf16 %v404_v36, %v404_v36  ;;  %v1753_v36 = vld [vmem:[#allocation13 + $0x20] sm:$0xff] }
  0xce   :  { %v349_v46 = vpop.f32.mrf.mxu2  ;;  %v903_v37 = vld [vmem:[#allocation1] sm:$0xff] }
  0xcf   :  { %803 = vmatmul.bf16.vlgmr.msra.gmra.mxu0 %v407_v14  ;;  %816 = vmatmul.bf16.vlgmr.msrb.gmra.mxu1 %v408_v39 }
  0xd0   :  { %1052 = vmatpush.bf16.msra.mxu0 %v1740_v4  ;;  %1065 = vmatpush.bf16.msrb.mxu1 %v1748_v5 }
  0xd4   :  { %1053 = vmatpush.bf16.msra.mxu0 %v1739_v8  ;;  %1066 = vmatpush.bf16.msrb.mxu1 %v1747_v9 }
  0xd8   :  { %1054 = vmatpush.bf16.msra.mxu0 %v1738_v10  ;;  %1067 = vmatpush.bf16.msrb.mxu1 %v1746_v11 }
  0xdc   :  { %1055 = vmatpush.bf16.msra.mxu0 %v1737_v12  ;;  %1068 = vmatpush.bf16.msrb.mxu1 %v1745_v13 }
  0xdf   :  { %855 = vmatmul.bf16.vlgmr.msrb.gmra.mxu0 %v407_v14  ;;  %868 = vmatmul.bf16.vlgmr.msra.gmra.mxu1 %v408_v39  ;;  %v905_v39 = vpack.i.b16 %v903_v37, %v903_v37 }
  0xe0   :  { %v360_v55 = vpop.f32.mrf.mxu3  ;;  %1056 = vmatpush.bf16.msra.mxu0 %v1736_v17  ;;  %1069 = vmatpush.bf16.msrb.mxu1 %v1744_v18  ;;  %v1771_v18 = vld [vmem:[%s2090_s8] ss:$0 sm:$0xff] }
  0xe1   :  { %v365_v56 = vpack.c.bf16 %v360_v55, %v347_v29  ;;  %v1756_v29 = vld [vmem:[#allocation13 + $0x38] sm:$0xff]  ;;  %v907_v47 = vperm.slane %v905_v39, 0 }
  0xe3   :  { %v387_v59 = vunpack.c.l.bf16 %v365_v56  ;;  %v388_v60 = vunpack.c.h.bf16 %v365_v56  ;;  %v913_v52 = vunpack.c.l.bf16 %v907_v47 }
  0xe4   :  { %1057 = vmatpush.bf16.msra.mxu0 %v1735_v21  ;;  %1070 = vmatpush.bf16.msrb.mxu1 %v1743_v22 }
  0xe5   :  { %v395_v61 = vadd.f32 %v391_v57, %v387_v59  ;;  %v396_v62 = vadd.f32 %v392_v58, %v388_v60 }
  0xe7   :  { %v406_v63 = vmax.f32 %v396_v62, 0.0  ;;  %v405_v0 = vmax.f32 %v395_v61, 0.0 }
  0xe8   :  { %v362_v1 = vpop.f32.mrf.mxu3  ;;  %1058 = vmatpush.bf16.msra.mxu0 %v1734_v23  ;;  %1071 = vmatpush.bf16.msrb.mxu1 %v1742_v24 }
  0xe9   :  { %v410_v2 = vpack.c.bf16 %v406_v63, %v406_v63  ;;  %v409_v3 = vpack.c.bf16 %v405_v0, %v405_v0  ;;  %v1751_v0 = vld [vmem:[#allocation13 + $0x10] sm:$0xff]  ;;  %v1750_v1 = vld [vmem:[#allocation13 + $0x8] sm:$0xff] }
  0xeb   :  { %829 = vmatmul.bf16.vlgmr.msrb.gmra.mxu2 %v409_v3  ;;  %842 = vmatmul.bf16.vlgmr.msra.gmra.mxu3 %v410_v2 }
  0xec   :  { %1059 = vmatpush.bf16.msra.mxu0 %v1733_v27  ;;  %1072 = vmatpush.bf16.msrb.mxu1 %v1741_v28 }
  0xed   :  { %1159 = vmatpush.bf16.msrb.mxu2 %v1756_v29 }
  0xf1   :  { %1160 = vmatpush.bf16.msrb.mxu2 %v1755_v32 }
  0xf5   :  { %1161 = vmatpush.bf16.msrb.mxu2 %v1754_v33 }
  0xf9   :  { %1162 = vmatpush.bf16.msrb.mxu2 %v1753_v36 }
  0xfb   :  { %881 = vmatmul.bf16.vlgmr.msra.gmra.mxu2 %v409_v3  ;;  %894 = vmatmul.bf16.vlgmr.msrb.gmra.mxu3 %v410_v2  ;;  %v1749_v2 = vld [vmem:[#allocation13] sm:$0xff]  ;;  %v1079_v3 = vld [vmem:[%s2088_s6] sm:$0x1]  ;;  %s1178_s6 = sshll.u32 %s1987_s25, 4  ;;  %s1179_s6 = int_to_ptr.vmem [resolvable:$true] %s1178_s6 }
  0xfc   :  { %v1081_v4 = vpack.i.b16 %v1079_v3, %v1079_v3 }
  0xfd   :  { %1163 = vmatpush.bf16.msrb.mxu2 %v1752_v41 }
  0xfe   :  { %v1083_v5 = vperm.slane %v1081_v4, 0 }
 0x100   :  { %v1085_v10 = vunpack.c.l.bf16 %v1083_v5 }
 0x101   :  { %1164 = vmatpush.bf16.msrb.mxu2 %v1751_v0 }
 0x105   :  { %1165 = vmatpush.bf16.msrb.mxu2 %v1750_v1 }
 0x109   :  { %1166 = vmatpush.bf16.msrb.mxu2 %v1749_v2 }
 0x14c   :  { %v804_v6 = vpop.f32.mrf.mxu0  ;;  %v817_v7 = vpop.f32.mrf.mxu1 }
 0x14d   :  { %v818_v14 = vadd.f32 %v817_v7, %v804_v6 }
 0x154   :  { %v806_v15 = vpop.f32.mrf.mxu0  ;;  %v819_v16 = vpop.f32.mrf.mxu1 }
 0x15c   :  { %v856_v19 = vpop.f32.mrf.mxu0  ;;  %v869_v20 = vpop.f32.mrf.mxu1 }
 0x15d   :  { %v870_v42 = vadd.f32 %v869_v20, %v856_v19 }
 0x164   :  { %v858_v25 = vpop.f32.mrf.mxu0  ;;  %v871_v26 = vpop.f32.mrf.mxu1 }
 0x16e   :  { %v830_v30 = vpop.f32.mrf.mxu2  ;;  %v843_v31 = vpop.f32.mrf.mxu3 }
 0x16f   :  { %v831_v43 = vadd.f32 %v830_v30, %v818_v14 }
 0x171   :  { %v844_v49 = vadd.f32 %v843_v31, %v831_v43 }
 0x176   :  { %v832_v34 = vpop.f32.mrf.mxu2  ;;  %v845_v35 = vpop.f32.mrf.mxu3 }
 0x17e   :  { %v882_v44 = vpop.f32.mrf.mxu2  ;;  %v895_v45 = vpop.f32.mrf.mxu3 }
 0x17f   :  { %v883_v46 = vadd.f32 %v882_v44, %v870_v42 }
 0x181   :  { %v896_v50 = vadd.f32 %v895_v45, %v883_v46 }
 0x183   :  { %v899_v51 = vpack.c.bf16 %v896_v50, %v844_v49 }
 0x185   :  { %v911_v54 = vunpack.c.l.bf16 %v899_v51  ;;  %v912_v55 = vunpack.c.h.bf16 %v899_v51 }
 0x186   :  { %v884_v56 = vpop.f32.mrf.mxu2  ;;  %v897_v57 = vpop.f32.mrf.mxu3 }
 0x187   :  { %v915_v58 = vadd.f32 %v913_v52, %v911_v54  ;;  %v916_v59 = vadd.f32 %v914_v53, %v912_v55 }
 0x189   :  { %v920_v60 = vmax.f32 %v915_v58, 0.0  ;;  %v921_v61 = vmax.f32 %v916_v59, 0.0 }
 0x18b   :  { %v922_v62 = vpack.c.bf16 %v920_v60, %v920_v60  ;;  %v923_v63 = vpack.c.bf16 %v921_v61, %v921_v61 }
 0x18d   :  { %1060 = vmatmul.bf16.vlgmr.msra.gmra.mxu0 %v922_v62  ;;  %1073 = vmatmul.bf16.vlgmr.msrb.gmra.mxu1 %v923_v63 }
 0x20a   :  { %v1061_v6 = vpop.f32.mrf.mxu0  ;;  %v1074_v7 = vpop.f32.mrf.mxu1 }
 0x20b   :  { %v1075_v8 = vadd.f32 %v1074_v7, %v1061_v6 }
 0x20d   :  { %v1078_v9 = vpack.c.bf16 %v1075_v8, %v1075_v8 }
 0x20f   :  { %v1084_v11 = vunpack.c.l.bf16 %v1078_v9 }
 0x211   :  { %v1086_v12 = vadd.f32 %v1085_v10, %v1084_v11 }
 0x212   :  { %v1063_v13 = vpop.f32.mrf.mxu0  ;;  %v1076_v15 = vpop.f32.mrf.mxu1 }
 0x213   :  { %v1089_v16 = vmax.f32 %v1086_v12, 0.0 }
 0x215   :  { %v1090_v17 = vpack.c.bf16 %v1089_v16, %v1089_v16 }
 0x217   :  { %1167 = vmatmul.bf16.vlgmr.msrb.gmra.mxu2 %v1090_v17 }
 0x29a   :  { %v1168_v19 = vpop.f32.mrf.mxu2 }
 0x29b   :  { %v1169_v20 = vadd.f32 %v1771_v18, %v1168_v19 }
 0x29d   :  { %1172 = vst [vmem:[#allocation14] sm:$0xff] %v1169_v20 }
 0x29e   :  { %1183 = dma.vmem_to_hbm [thread:$0]  %s1179_s6, 128, %s1181_s3, [#allocation4]  }
 0x2a2   :  { %v1170_v21 = vpop.f32.mrf.mxu2 }
 0x2a3   :  { %1972 = dma.done.wait [#allocation4], 128  }
 0x2a4   :  { %1973 = vsyncadd [#allocation4], 4294967168 }
 0x2a5   :  { %1188 = vsyncpa [#allocation3], 1 }
 0x2a6   :  { %1189 = vsyncpa [#allocation6], 1 }
 0x2a7   :  { %1190 = vsyncpa [#allocation9], 1 }
 0x2a8   :  { %1191 = vsyncpa [#allocation12], 1 }
 0x2a9   :  { %1192 = vsyncpa [#allocation4], 1 }

</bundles_post_ra>
